<compile_context>
chip_gen: v6e
topology: v6e:2x2x1
jax: 0.10.0
libtpu: 0.0.40
codegen_flags: <defaults>
</compile_context>

<pallas_src>
import jax
import jax.numpy as jnp
from jax.experimental import pallas as pl
from jax.experimental.pallas import tpu as pltpu

EPS = 1e-5

_PARALLEL = pltpu.CompilerParams(dimension_semantics=("parallel",))


def _pick_batch_tile(batch):
    """Largest sublane/MXU-friendly tile that divides the batch."""
    for tb in (512, 256, 128, 64, 32, 16, 8):
        if batch % tb == 0:
            return tb
    return batch  # block == full dim is always a legal BlockSpec


# ---------------------------------------------------------------------------
# Kernels.  Activations are (batch, features) = (sublane, lane).  Weights are
# pre-transposed to (in_features, out_features) and passed as bf16 so the MXU
# runs native bf16 passes; accumulation stays f32 via preferred_element_type.
# ---------------------------------------------------------------------------


def _first_layer_kernel(x_ref, w_ref, y_ref, sum_ref, sq_ref):
    # y = x @ W1 (bias dropped: cancelled by the following BN's mean sub).
    # Also emit this tile's per-feature partial sum / sum-of-squares.
    y = jnp.dot(x_ref[...].astype(jnp.bfloat16), w_ref[...],
                preferred_element_type=jnp.float32)
    y_ref[...] = y
    sum_ref[...] = jnp.sum(y, axis=0, keepdims=True)[None]
    sq_ref[...] = jnp.sum(y * y, axis=0, keepdims=True)[None]


def _mid_layer_kernel(y_ref, scale_ref, shift_ref, w_ref, o_ref, sum_ref, sq_ref):
    # Folded training-mode BN (per-feature scale/shift) + ReLU of the previous
    # layer's pre-activation, then the next Linear (bias dropped), plus stats.
    h = jnp.maximum(y_ref[...] * scale_ref[...] + shift_ref[...], 0.0)
    y = jnp.dot(h.astype(jnp.bfloat16), w_ref[...],
                preferred_element_type=jnp.float32)
    o_ref[...] = y
    sum_ref[...] = jnp.sum(y, axis=0, keepdims=True)[None]
    sq_ref[...] = jnp.sum(y * y, axis=0, keepdims=True)[None]


def _last_layer_kernel(y_ref, scale_ref, shift_ref, w_ref, b_ref, o_ref):
    # Folded BN + ReLU, final Linear (bias kept), softplus (beta=1, thr=20).
    h = jnp.maximum(y_ref[...] * scale_ref[...] + shift_ref[...], 0.0)
    y = jnp.dot(h.astype(jnp.bfloat16), w_ref[...],
                preferred_element_type=jnp.float32) + b_ref[...]
    o_ref[...] = jnp.where(y > 20.0, y, jnp.log1p(jnp.exp(jnp.minimum(y, 20.0))))


# ---------------------------------------------------------------------------
# Per-layer pallas_call wrappers (batch tiled, grid axis parallel).
# ---------------------------------------------------------------------------


def _layer_first(x, w, tb):
    b, din = x.shape
    dout = w.shape[1]
    nt = b // tb
    y, s, q = pl.pallas_call(
        _first_layer_kernel,
        out_shape=(
            jax.ShapeDtypeStruct((b, dout), jnp.float32),
            jax.ShapeDtypeStruct((nt, 1, dout), jnp.float32),
            jax.ShapeDtypeStruct((nt, 1, dout), jnp.float32),
        ),
        grid=(nt,),
        in_specs=[
            pl.BlockSpec((tb, din), lambda i: (i, 0)),
            pl.BlockSpec((din, dout), lambda i: (0, 0)),
        ],
        out_specs=(
            pl.BlockSpec((tb, dout), lambda i: (i, 0)),
            pl.BlockSpec((1, 1, dout), lambda i: (i, 0, 0)),
            pl.BlockSpec((1, 1, dout), lambda i: (i, 0, 0)),
        ),
        compiler_params=_PARALLEL,
    )(x, w)
    return y, jnp.sum(s, axis=0), jnp.sum(q, axis=0)


def _layer_mid(y_prev, scale, shift, w, tb):
    b, din = y_prev.shape
    dout = w.shape[1]
    nt = b // tb
    y, s, q = pl.pallas_call(
        _mid_layer_kernel,
        out_shape=(
            jax.ShapeDtypeStruct((b, dout), jnp.float32),
            jax.ShapeDtypeStruct((nt, 1, dout), jnp.float32),
            jax.ShapeDtypeStruct((nt, 1, dout), jnp.float32),
        ),
        grid=(nt,),
        in_specs=[
            pl.BlockSpec((tb, din), lambda i: (i, 0)),
            pl.BlockSpec((1, din), lambda i: (0, 0)),
            pl.BlockSpec((1, din), lambda i: (0, 0)),
            pl.BlockSpec((din, dout), lambda i: (0, 0)),
        ],
        out_specs=(
            pl.BlockSpec((tb, dout), lambda i: (i, 0)),
            pl.BlockSpec((1, 1, dout), lambda i: (i, 0, 0)),
            pl.BlockSpec((1, 1, dout), lambda i: (i, 0, 0)),
        ),
        compiler_params=_PARALLEL,
    )(y_prev, scale, shift, w)
    return y, jnp.sum(s, axis=0), jnp.sum(q, axis=0)


def _layer_last(y_prev, scale, shift, w, bias, tb):
    b, din = y_prev.shape
    dout = w.shape[1]
    nt = b // tb
    return pl.pallas_call(
        _last_layer_kernel,
        out_shape=jax.ShapeDtypeStruct((b, dout), jnp.float32),
        grid=(nt,),
        in_specs=[
            pl.BlockSpec((tb, din), lambda i: (i, 0)),
            pl.BlockSpec((1, din), lambda i: (0, 0)),
            pl.BlockSpec((1, din), lambda i: (0, 0)),
            pl.BlockSpec((din, dout), lambda i: (0, 0)),
            pl.BlockSpec((1, dout), lambda i: (0, 0)),
        ],
        out_specs=pl.BlockSpec((tb, dout), lambda i: (i, 0)),
        compiler_params=_PARALLEL,
    )(y_prev, scale, shift, w, bias)


def _bn_fold(s, q, count, g, be):
    """Per-feature (1, D) fold of training-mode BN into scale/shift."""
    mean = s / count
    var = jnp.maximum(q / count - mean * mean, 0.0)  # biased batch variance
    scale = g * jax.lax.rsqrt(var + EPS)
    shift = be - mean * scale
    return scale, shift


@jax.jit
def estimate_rho_bn(x, params):
    """x: (B, input_dim) float32.  params: dict of weights (see init_params)."""
    b = x.shape[0]
    tb = _pick_batch_tile(b)
    count = float(b)

    # Weights to bf16 for native MXU passes (accumulation stays f32).
    w1 = params["w1"].astype(jnp.bfloat16)
    w2 = params["w2"].astype(jnp.bfloat16)
    w3 = params["w3"].astype(jnp.bfloat16)
    w4 = params["w4"].astype(jnp.bfloat16)
    # b1/b2/b3 intentionally unused: cancelled by training-mode BN mean sub.

    y1, s1, q1 = _layer_first(x, w1, tb)
    sc1, sh1 = _bn_fold(s1, q1, count, params["g1"], params["be1"])

    y2, s2, q2 = _layer_mid(y1, sc1, sh1, w2, tb)
    sc2, sh2 = _bn_fold(s2, q2, count, params["g2"], params["be2"])

    y3, s3, q3 = _layer_mid(y2, sc2, sh2, w3, tb)
    sc3, sh3 = _bn_fold(s3, q3, count, params["g3"], params["be3"])

    return _layer_last(y3, sc3, sh3, w4, params["b4"], tb)


def init_params(key, input_dim, output_dim):
    """Deterministic, PyTorch-default-style init (uniform +/- 1/sqrt(fan_in))."""
    dims = [(input_dim, 512), (512, 128), (128, 32), (32, output_dim)]
    params = {}
    keys = jax.random.split(key, 2 * len(dims))
    for i, (din, dout) in enumerate(dims):
        bound = 1.0 / (din ** 0.5)
        w = jax.random.uniform(keys[2 * i], (din, dout), jnp.float32, -bound, bound)
        b = jax.random.uniform(keys[2 * i + 1], (1, dout), jnp.float32, -bound, bound)
        params[f"w{i + 1}"] = w
        params[f"b{i + 1}"] = b
        if i < 3:  # BatchNorm affine params for the first three linear layers
            params[f"g{i + 1}"] = jnp.ones((1, dout), jnp.float32)
            params[f"be{i + 1}"] = jnp.zeros((1, dout), jnp.float32)
    return params


def reference_forward(x, params):
    """Pure-JAX f32 reference of the PyTorch module (training-mode BN)."""
    h = x
    for i in range(1, 4):
        y = h @ params[f"w{i}"] + params[f"b{i}"]
        m = jnp.mean(y, axis=0, keepdims=True)
        v = jnp.mean((y - m) ** 2, axis=0, keepdims=True)
        h = jnp.maximum((y - m) / jnp.sqrt(v + EPS) * params[f"g{i}"] + params[f"be{i}"], 0.0)
    y = h @ params["w4"] + params["b4"]
    return jnp.where(y > 20.0, y, jnp.log1p(jnp.exp(jnp.minimum(y, 20.0))))


if __name__ == "__main__":
    input_dim = 32
    output_dim = 4
    batch = 8

    key = jax.random.PRNGKey(0)
    kx, kp = jax.random.split(key)
    x = jax.random.normal(kx, (batch, input_dim), jnp.float32)
    params = init_params(kp, input_dim, output_dim)

    out = jax.block_until_ready(estimate_rho_bn(x, params))
    ref = reference_forward(x, params)

    assert out.shape == (batch, output_dim)
    # bf16 MXU inputs + E[y^2]-mean^2 variance form introduce small drift vs
    # the f32 reference; validate with a correspondingly relaxed tolerance.
    assert jnp.allclose(out, ref, atol=5e-2, rtol=5e-2), "mismatch vs JAX reference"

    print("KERNEL_OK")
</pallas_src>

<mosaic_0001>
module attributes {stable_mosaic.version = 11 : i64} {
  func.func @_first_layer_kernel(%arg0: i32, %arg1: memref<8x32xf32, #tpu.memory_space<vmem>>, %arg2: memref<32x512xbf16, #tpu.memory_space<vmem>>, %arg3: memref<8x512xf32, #tpu.memory_space<vmem>>, %arg4: memref<1x1x512xf32, #tpu.memory_space<vmem>>, %arg5: memref<1x1x512xf32, #tpu.memory_space<vmem>>) attributes {dimension_semantics = [#tpu.dimension_semantics<parallel>], iteration_bounds = array<i64: 1>, scalar_prefetch = 0 : i64, scratch_operands = 0 : i64, tpu.core_type = #tpu.core_type<tc>, window_params = [{transform_indices = @transform_0, window_bounds = array<i64: 8, 32>}, {pipeline_mode = #tpu.pipeline_mode<synchronous>, transform_indices = @transform_1, window_bounds = array<i64: 32, 512>}, {transform_indices = @transform_2, window_bounds = array<i64: 8, 512>}, {transform_indices = @transform_3, window_bounds = array<i64: 1, 1, 512>}, {transform_indices = @transform_4, window_bounds = array<i64: 1, 1, 512>}]} {
    %c0 = arith.constant 0 : index
    %c0_0 = arith.constant 0 : index
    %0 = vector.load %arg1[%c0, %c0_0] : memref<8x32xf32, #tpu.memory_space<vmem>>, vector<8x32xf32>
    %1 = arith.truncf %0 : vector<8x32xf32> to vector<8x32xbf16>
    %c0_1 = arith.constant 0 : index
    %c0_2 = arith.constant 0 : index
    %2 = vector.load %arg2[%c0_1, %c0_2] : memref<32x512xbf16, #tpu.memory_space<vmem>>, vector<32x512xbf16>
    %cst = arith.constant dense<0.000000e+00> : vector<8x512xf32>
    %3 = tpu.matmul %1, %2, %cst {dimension_numbers = #tpu.dot_dimension_numbers<[1], [0], [0], [1], [0, 0, 1, 1], [], []>} : vector<8x32xbf16>, vector<32x512xbf16>, vector<8x512xf32> -> vector<8x512xf32>
    %c0_3 = arith.constant 0 : index
    %c0_4 = arith.constant 0 : index
    %4 = vector.load %arg3[%c0_3, %c0_4] : memref<8x512xf32, #tpu.memory_space<vmem>>, vector<8x512xf32>
    tpu.vector_store %arg3[%c0_3, %c0_4], %3 {strides = array<i32>} : memref<8x512xf32, #tpu.memory_space<vmem>>, vector<8x512xf32>,
    %cst_5 = arith.constant dense<0.000000e+00> : vector<512xf32>
    %5 = vector.multi_reduction <add>, %3, %cst_5 [0] : vector<8x512xf32> to vector<512xf32>
    %6 = vector.shape_cast %5 : vector<512xf32> to vector<1x512xf32>
    %7 = vector.shape_cast %6 : vector<1x512xf32> to vector<1x1x512xf32>
    %c0_6 = arith.constant 0 : index
    %c0_7 = arith.constant 0 : index
    %c0_8 = arith.constant 0 : index
    %8 = vector.load %arg4[%c0_6, %c0_7, %c0_8] : memref<1x1x512xf32, #tpu.memory_space<vmem>>, vector<1x1x512xf32>
    tpu.vector_store %arg4[%c0_6, %c0_7, %c0_8], %7 {strides = array<i32>} : memref<1x1x512xf32, #tpu.memory_space<vmem>>, vector<1x1x512xf32>,
    %9 = arith.mulf %3, %3 : vector<8x512xf32>
    %cst_9 = arith.constant dense<0.000000e+00> : vector<512xf32>
    %10 = vector.multi_reduction <add>, %9, %cst_9 [0] : vector<8x512xf32> to vector<512xf32>
    %11 = vector.shape_cast %10 : vector<512xf32> to vector<1x512xf32>
    %12 = vector.shape_cast %11 : vector<1x512xf32> to vector<1x1x512xf32>
    %c0_10 = arith.constant 0 : index
    %c0_11 = arith.constant 0 : index
    %c0_12 = arith.constant 0 : index
    %13 = vector.load %arg5[%c0_10, %c0_11, %c0_12] : memref<1x1x512xf32, #tpu.memory_space<vmem>>, vector<1x1x512xf32>
    tpu.vector_store %arg5[%c0_10, %c0_11, %c0_12], %12 {strides = array<i32>} : memref<1x1x512xf32, #tpu.memory_space<vmem>>, vector<1x1x512xf32>,
    return
  }
  func.func @transform_0(%arg0: i32) -> (i32, i32) {
    %c0_i32 = arith.constant 0 : i32
    %c0_i32_0 = arith.constant 0 : i32
    return %arg0, %c0_i32 : i32, i32
  }
  func.func @transform_1(%arg0: i32) -> (i32, i32) {
    %c0_i32 = arith.constant 0 : i32
    %c0_i32_0 = arith.constant 0 : i32
    %c0_i32_1 = arith.constant 0 : i32
    return %c0_i32, %c0_i32_0 : i32, i32
  }
  func.func @transform_2(%arg0: i32) -> (i32, i32) {
    %c0_i32 = arith.constant 0 : i32
    %c0_i32_0 = arith.constant 0 : i32
    return %arg0, %c0_i32 : i32, i32
  }
  func.func @transform_3(%arg0: i32) -> (i32, i32, i32) {
    %c0_i32 = arith.constant 0 : i32
    %c0_i32_0 = arith.constant 0 : i32
    %c0_i32_1 = arith.constant 0 : i32
    return %arg0, %c0_i32, %c0_i32_0 : i32, i32, i32
  }
  func.func @transform_4(%arg0: i32) -> (i32, i32, i32) {
    %c0_i32 = arith.constant 0 : i32
    %c0_i32_0 = arith.constant 0 : i32
    %c0_i32_1 = arith.constant 0 : i32
    return %arg0, %c0_i32, %c0_i32_0 : i32, i32, i32
  }
}

module attributes {stable_mosaic.version = 11 : i64} {
  func.func @_last_layer_kernel(%arg0: i32, %arg1: memref<8x32xf32, #tpu.memory_space<vmem>>, %arg2: memref<1x32xf32, #tpu.memory_space<vmem>>, %arg3: memref<1x32xf32, #tpu.memory_space<vmem>>, %arg4: memref<32x4xbf16, #tpu.memory_space<vmem>>, %arg5: memref<1x4xf32, #tpu.memory_space<vmem>>, %arg6: memref<8x4xf32, #tpu.memory_space<vmem>>) attributes {dimension_semantics = [#tpu.dimension_semantics<parallel>], iteration_bounds = array<i64: 1>, scalar_prefetch = 0 : i64, scratch_operands = 0 : i64, tpu.core_type = #tpu.core_type<tc>, window_params = [{transform_indices = @transform_0, window_bounds = array<i64: 8, 32>}, {pipeline_mode = #tpu.pipeline_mode<synchronous>, transform_indices = @transform_1, window_bounds = array<i64: 1, 32>}, {pipeline_mode = #tpu.pipeline_mode<synchronous>, transform_indices = @transform_2, window_bounds = array<i64: 1, 32>}, {pipeline_mode = #tpu.pipeline_mode<synchronous>, transform_indices = @transform_3, window_bounds = array<i64: 32, 4>}, {pipeline_mode = #tpu.pipeline_mode<synchronous>, transform_indices = @transform_4, window_bounds = array<i64: 1, 4>}, {transform_indices = @transform_5, window_bounds = array<i64: 8, 4>}]} {
    %c0 = arith.constant 0 : index
    %c0_0 = arith.constant 0 : index
    %0 = vector.load %arg1[%c0, %c0_0] : memref<8x32xf32, #tpu.memory_space<vmem>>, vector<8x32xf32>
    %c0_1 = arith.constant 0 : index
    %c0_2 = arith.constant 0 : index
    %1 = vector.load %arg2[%c0_1, %c0_2] : memref<1x32xf32, #tpu.memory_space<vmem>>, vector<1x32xf32>
    %2 = vector.broadcast %1 : vector<1x32xf32> to vector<8x32xf32>
    %3 = arith.mulf %0, %2 : vector<8x32xf32>
    %c0_3 = arith.constant 0 : index
    %c0_4 = arith.constant 0 : index
    %4 = vector.load %arg3[%c0_3, %c0_4] : memref<1x32xf32, #tpu.memory_space<vmem>>, vector<1x32xf32>
    %5 = vector.broadcast %4 : vector<1x32xf32> to vector<8x32xf32>
    %6 = arith.addf %3, %5 : vector<8x32xf32>
    %cst = arith.constant 0.000000e+00 : f32
    %7 = vector.broadcast %cst : f32 to vector<8x32xf32>
    %8 = arith.maximumf %6, %7 : vector<8x32xf32>
    %9 = arith.truncf %8 : vector<8x32xf32> to vector<8x32xbf16>
    %c0_5 = arith.constant 0 : index
    %c0_6 = arith.constant 0 : index
    %10 = vector.load %arg4[%c0_5, %c0_6] : memref<32x4xbf16, #tpu.memory_space<vmem>>, vector<32x4xbf16>
    %cst_7 = arith.constant dense<0.000000e+00> : vector<8x4xf32>
    %11 = tpu.matmul %9, %10, %cst_7 {dimension_numbers = #tpu.dot_dimension_numbers<[1], [0], [0], [1], [0, 0, 1, 1], [], []>} : vector<8x32xbf16>, vector<32x4xbf16>, vector<8x4xf32> -> vector<8x4xf32>
    %c0_8 = arith.constant 0 : index
    %c0_9 = arith.constant 0 : index
    %12 = vector.load %arg5[%c0_8, %c0_9] : memref<1x4xf32, #tpu.memory_space<vmem>>, vector<1x4xf32>
    %13 = vector.broadcast %12 : vector<1x4xf32> to vector<8x4xf32>
    %14 = arith.addf %11, %13 : vector<8x4xf32>
    %cst_10 = arith.constant 2.000000e+01 : f32
    %15 = vector.broadcast %cst_10 : f32 to vector<8x4xf32>
    %16 = arith.cmpf ogt, %14, %15 : vector<8x4xf32>
    %cst_11 = arith.constant 2.000000e+01 : f32
    %17 = vector.broadcast %cst_11 : f32 to vector<8x4xf32>
    %18 = arith.minimumf %14, %17 : vector<8x4xf32>
    %19 = math.exp %18 : vector<8x4xf32>
    %20 = math.log1p %19 : vector<8x4xf32>
    %21 = arith.select %16, %14, %20 : vector<8x4xi1>, vector<8x4xf32>
    %c0_12 = arith.constant 0 : index
    %c0_13 = arith.constant 0 : index
    %22 = vector.load %arg6[%c0_12, %c0_13] : memref<8x4xf32, #tpu.memory_space<vmem>>, vector<8x4xf32>
    tpu.vector_store %arg6[%c0_12, %c0_13], %21 {strides = array<i32>} : memref<8x4xf32, #tpu.memory_space<vmem>>, vector<8x4xf32>,
    return
  }
  func.func @transform_0(%arg0: i32) -> (i32, i32) {
    %c0_i32 = arith.constant 0 : i32
    %c0_i32_0 = arith.constant 0 : i32
    return %arg0, %c0_i32 : i32, i32
  }
  func.func @transform_1(%arg0: i32) -> (i32, i32) {
    %c0_i32 = arith.constant 0 : i32
    %c0_i32_0 = arith.constant 0 : i32
    %c0_i32_1 = arith.constant 0 : i32
    return %c0_i32, %c0_i32_0 : i32, i32
  }
  func.func @transform_2(%arg0: i32) -> (i32, i32) {
    %c0_i32 = arith.constant 0 : i32
    %c0_i32_0 = arith.constant 0 : i32
    %c0_i32_1 = arith.constant 0 : i32
    return %c0_i32, %c0_i32_0 : i32, i32
  }
  func.func @transform_3(%arg0: i32) -> (i32, i32) {
    %c0_i32 = arith.constant 0 : i32
    %c0_i32_0 = arith.constant 0 : i32
    %c0_i32_1 = arith.constant 0 : i32
    return %c0_i32, %c0_i32_0 : i32, i32
  }
  func.func @transform_4(%arg0: i32) -> (i32, i32) {
    %c0_i32 = arith.constant 0 : i32
    %c0_i32_0 = arith.constant 0 : i32
    %c0_i32_1 = arith.constant 0 : i32
    return %c0_i32, %c0_i32_0 : i32, i32
  }
  func.func @transform_5(%arg0: i32) -> (i32, i32) {
    %c0_i32 = arith.constant 0 : i32
    %c0_i32_0 = arith.constant 0 : i32
    return %arg0, %c0_i32 : i32, i32
  }
}

module attributes {stable_mosaic.version = 11 : i64} {
  func.func @_mid_layer_kernel(%arg0: i32, %arg1: memref<8x512xf32, #tpu.memory_space<vmem>>, %arg2: memref<1x512xf32, #tpu.memory_space<vmem>>, %arg3: memref<1x512xf32, #tpu.memory_space<vmem>>, %arg4: memref<512x128xbf16, #tpu.memory_space<vmem>>, %arg5: memref<8x128xf32, #tpu.memory_space<vmem>>, %arg6: memref<1x1x128xf32, #tpu.memory_space<vmem>>, %arg7: memref<1x1x128xf32, #tpu.memory_space<vmem>>) attributes {dimension_semantics = [#tpu.dimension_semantics<parallel>], iteration_bounds = array<i64: 1>, scalar_prefetch = 0 : i64, scratch_operands = 0 : i64, tpu.core_type = #tpu.core_type<tc>, window_params = [{transform_indices = @transform_0, window_bounds = array<i64: 8, 512>}, {pipeline_mode = #tpu.pipeline_mode<synchronous>, transform_indices = @transform_1, window_bounds = array<i64: 1, 512>}, {pipeline_mode = #tpu.pipeline_mode<synchronous>, transform_indices = @transform_2, window_bounds = array<i64: 1, 512>}, {pipeline_mode = #tpu.pipeline_mode<synchronous>, transform_indices = @transform_3, window_bounds = array<i64: 512, 128>}, {transform_indices = @transform_4, window_bounds = array<i64: 8, 128>}, {transform_indices = @transform_5, window_bounds = array<i64: 1, 1, 128>}, {transform_indices = @transform_6, window_bounds = array<i64: 1, 1, 128>}]} {
    %c0 = arith.constant 0 : index
    %c0_0 = arith.constant 0 : index
    %0 = vector.load %arg1[%c0, %c0_0] : memref<8x512xf32, #tpu.memory_space<vmem>>, vector<8x512xf32>
    %c0_1 = arith.constant 0 : index
    %c0_2 = arith.constant 0 : index
    %1 = vector.load %arg2[%c0_1, %c0_2] : memref<1x512xf32, #tpu.memory_space<vmem>>, vector<1x512xf32>
    %2 = vector.broadcast %1 : vector<1x512xf32> to vector<8x512xf32>
    %3 = arith.mulf %0, %2 : vector<8x512xf32>
    %c0_3 = arith.constant 0 : index
    %c0_4 = arith.constant 0 : index
    %4 = vector.load %arg3[%c0_3, %c0_4] : memref<1x512xf32, #tpu.memory_space<vmem>>, vector<1x512xf32>
    %5 = vector.broadcast %4 : vector<1x512xf32> to vector<8x512xf32>
    %6 = arith.addf %3, %5 : vector<8x512xf32>
    %cst = arith.constant 0.000000e+00 : f32
    %7 = vector.broadcast %cst : f32 to vector<8x512xf32>
    %8 = arith.maximumf %6, %7 : vector<8x512xf32>
    %9 = arith.truncf %8 : vector<8x512xf32> to vector<8x512xbf16>
    %c0_5 = arith.constant 0 : index
    %c0_6 = arith.constant 0 : index
    %10 = vector.load %arg4[%c0_5, %c0_6] : memref<512x128xbf16, #tpu.memory_space<vmem>>, vector<512x128xbf16>
    %cst_7 = arith.constant dense<0.000000e+00> : vector<8x128xf32>
    %11 = tpu.matmul %9, %10, %cst_7 {dimension_numbers = #tpu.dot_dimension_numbers<[1], [0], [0], [1], [0, 0, 1, 1], [], []>} : vector<8x512xbf16>, vector<512x128xbf16>, vector<8x128xf32> -> vector<8x128xf32>
    %c0_8 = arith.constant 0 : index
    %c0_9 = arith.constant 0 : index
    %12 = vector.load %arg5[%c0_8, %c0_9] : memref<8x128xf32, #tpu.memory_space<vmem>>, vector<8x128xf32>
    tpu.vector_store %arg5[%c0_8, %c0_9], %11 {strides = array<i32>} : memref<8x128xf32, #tpu.memory_space<vmem>>, vector<8x128xf32>,
    %cst_10 = arith.constant dense<0.000000e+00> : vector<128xf32>
    %13 = vector.multi_reduction <add>, %11, %cst_10 [0] : vector<8x128xf32> to vector<128xf32>
    %14 = vector.shape_cast %13 : vector<128xf32> to vector<1x128xf32>
    %15 = vector.shape_cast %14 : vector<1x128xf32> to vector<1x1x128xf32>
    %c0_11 = arith.constant 0 : index
    %c0_12 = arith.constant 0 : index
    %c0_13 = arith.constant 0 : index
    %16 = vector.load %arg6[%c0_11, %c0_12, %c0_13] : memref<1x1x128xf32, #tpu.memory_space<vmem>>, vector<1x1x128xf32>
    tpu.vector_store %arg6[%c0_11, %c0_12, %c0_13], %15 {strides = array<i32>} : memref<1x1x128xf32, #tpu.memory_space<vmem>>, vector<1x1x128xf32>,
    %17 = arith.mulf %11, %11 : vector<8x128xf32>
    %cst_14 = arith.constant dense<0.000000e+00> : vector<128xf32>
    %18 = vector.multi_reduction <add>, %17, %cst_14 [0] : vector<8x128xf32> to vector<128xf32>
    %19 = vector.shape_cast %18 : vector<128xf32> to vector<1x128xf32>
    %20 = vector.shape_cast %19 : vector<1x128xf32> to vector<1x1x128xf32>
    %c0_15 = arith.constant 0 : index
    %c0_16 = arith.constant 0 : index
    %c0_17 = arith.constant 0 : index
    %21 = vector.load %arg7[%c0_15, %c0_16, %c0_17] : memref<1x1x128xf32, #tpu.memory_space<vmem>>, vector<1x1x128xf32>
    tpu.vector_store %arg7[%c0_15, %c0_16, %c0_17], %20 {strides = array<i32>} : memref<1x1x128xf32, #tpu.memory_space<vmem>>, vector<1x1x128xf32>,
    return
  }
  func.func @transform_0(%arg0: i32) -> (i32, i32) {
    %c0_i32 = arith.constant 0 : i32
    %c0_i32_0 = arith.constant 0 : i32
    return %arg0, %c0_i32 : i32, i32
  }
  func.func @transform_1(%arg0: i32) -> (i32, i32) {
    %c0_i32 = arith.constant 0 : i32
    %c0_i32_0 = arith.constant 0 : i32
    %c0_i32_1 = arith.constant 0 : i32
    return %c0_i32, %c0_i32_0 : i32, i32
  }
  func.func @transform_2(%arg0: i32) -> (i32, i32) {
    %c0_i32 = arith.constant 0 : i32
    %c0_i32_0 = arith.constant 0 : i32
    %c0_i32_1 = arith.constant 0 : i32
    return %c0_i32, %c0_i32_0 : i32, i32
  }
  func.func @transform_3(%arg0: i32) -> (i32, i32) {
    %c0_i32 = arith.constant 0 : i32
    %c0_i32_0 = arith.constant 0 : i32
    %c0_i32_1 = arith.constant 0 : i32
    return %c0_i32, %c0_i32_0 : i32, i32
  }
  func.func @transform_4(%arg0: i32) -> (i32, i32) {
    %c0_i32 = arith.constant 0 : i32
    %c0_i32_0 = arith.constant 0 : i32
    return %arg0, %c0_i32 : i32, i32
  }
  func.func @transform_5(%arg0: i32) -> (i32, i32, i32) {
    %c0_i32 = arith.constant 0 : i32
    %c0_i32_0 = arith.constant 0 : i32
    %c0_i32_1 = arith.constant 0 : i32
    return %arg0, %c0_i32, %c0_i32_0 : i32, i32, i32
  }
  func.func @transform_6(%arg0: i32) -> (i32, i32, i32) {
    %c0_i32 = arith.constant 0 : i32
    %c0_i32_0 = arith.constant 0 : i32
    %c0_i32_1 = arith.constant 0 : i32
    return %arg0, %c0_i32, %c0_i32_0 : i32, i32, i32
  }
}

module attributes {stable_mosaic.version = 11 : i64} {
  func.func @_mid_layer_kernel(%arg0: i32, %arg1: memref<8x128xf32, #tpu.memory_space<vmem>>, %arg2: memref<1x128xf32, #tpu.memory_space<vmem>>, %arg3: memref<1x128xf32, #tpu.memory_space<vmem>>, %arg4: memref<128x32xbf16, #tpu.memory_space<vmem>>, %arg5: memref<8x32xf32, #tpu.memory_space<vmem>>, %arg6: memref<1x1x32xf32, #tpu.memory_space<vmem>>, %arg7: memref<1x1x32xf32, #tpu.memory_space<vmem>>) attributes {dimension_semantics = [#tpu.dimension_semantics<parallel>], iteration_bounds = array<i64: 1>, scalar_prefetch = 0 : i64, scratch_operands = 0 : i64, tpu.core_type = #tpu.core_type<tc>, window_params = [{transform_indices = @transform_0, window_bounds = array<i64: 8, 128>}, {pipeline_mode = #tpu.pipeline_mode<synchronous>, transform_indices = @transform_1, window_bounds = array<i64: 1, 128>}, {pipeline_mode = #tpu.pipeline_mode<synchronous>, transform_indices = @transform_2, window_bounds = array<i64: 1, 128>}, {pipeline_mode = #tpu.pipeline_mode<synchronous>, transform_indices = @transform_3, window_bounds = array<i64: 128, 32>}, {transform_indices = @transform_4, window_bounds = array<i64: 8, 32>}, {transform_indices = @transform_5, window_bounds = array<i64: 1, 1, 32>}, {transform_indices = @transform_6, window_bounds = array<i64: 1, 1, 32>}]} {
    %c0 = arith.constant 0 : index
    %c0_0 = arith.constant 0 : index
    %0 = vector.load %arg1[%c0, %c0_0] : memref<8x128xf32, #tpu.memory_space<vmem>>, vector<8x128xf32>
    %c0_1 = arith.constant 0 : index
    %c0_2 = arith.constant 0 : index
    %1 = vector.load %arg2[%c0_1, %c0_2] : memref<1x128xf32, #tpu.memory_space<vmem>>, vector<1x128xf32>
    %2 = vector.broadcast %1 : vector<1x128xf32> to vector<8x128xf32>
    %3 = arith.mulf %0, %2 : vector<8x128xf32>
    %c0_3 = arith.constant 0 : index
    %c0_4 = arith.constant 0 : index
    %4 = vector.load %arg3[%c0_3, %c0_4] : memref<1x128xf32, #tpu.memory_space<vmem>>, vector<1x128xf32>
    %5 = vector.broadcast %4 : vector<1x128xf32> to vector<8x128xf32>
    %6 = arith.addf %3, %5 : vector<8x128xf32>
    %cst = arith.constant 0.000000e+00 : f32
    %7 = vector.broadcast %cst : f32 to vector<8x128xf32>
    %8 = arith.maximumf %6, %7 : vector<8x128xf32>
    %9 = arith.truncf %8 : vector<8x128xf32> to vector<8x128xbf16>
    %c0_5 = arith.constant 0 : index
    %c0_6 = arith.constant 0 : index
    %10 = vector.load %arg4[%c0_5, %c0_6] : memref<128x32xbf16, #tpu.memory_space<vmem>>, vector<128x32xbf16>
    %cst_7 = arith.constant dense<0.000000e+00> : vector<8x32xf32>
    %11 = tpu.matmul %9, %10, %cst_7 {dimension_numbers = #tpu.dot_dimension_numbers<[1], [0], [0], [1], [0, 0, 1, 1], [], []>} : vector<8x128xbf16>, vector<128x32xbf16>, vector<8x32xf32> -> vector<8x32xf32>
    %c0_8 = arith.constant 0 : index
    %c0_9 = arith.constant 0 : index
    %12 = vector.load %arg5[%c0_8, %c0_9] : memref<8x32xf32, #tpu.memory_space<vmem>>, vector<8x32xf32>
    tpu.vector_store %arg5[%c0_8, %c0_9], %11 {strides = array<i32>} : memref<8x32xf32, #tpu.memory_space<vmem>>, vector<8x32xf32>,
    %cst_10 = arith.constant dense<0.000000e+00> : vector<32xf32>
    %13 = vector.multi_reduction <add>, %11, %cst_10 [0] : vector<8x32xf32> to vector<32xf32>
    %14 = vector.shape_cast %13 : vector<32xf32> to vector<1x32xf32>
    %15 = vector.shape_cast %14 : vector<1x32xf32> to vector<1x1x32xf32>
    %c0_11 = arith.constant 0 : index
    %c0_12 = arith.constant 0 : index
    %c0_13 = arith.constant 0 : index
    %16 = vector.load %arg6[%c0_11, %c0_12, %c0_13] : memref<1x1x32xf32, #tpu.memory_space<vmem>>, vector<1x1x32xf32>
    tpu.vector_store %arg6[%c0_11, %c0_12, %c0_13], %15 {strides = array<i32>} : memref<1x1x32xf32, #tpu.memory_space<vmem>>, vector<1x1x32xf32>,
    %17 = arith.mulf %11, %11 : vector<8x32xf32>
    %cst_14 = arith.constant dense<0.000000e+00> : vector<32xf32>
    %18 = vector.multi_reduction <add>, %17, %cst_14 [0] : vector<8x32xf32> to vector<32xf32>
    %19 = vector.shape_cast %18 : vector<32xf32> to vector<1x32xf32>
    %20 = vector.shape_cast %19 : vector<1x32xf32> to vector<1x1x32xf32>
    %c0_15 = arith.constant 0 : index
    %c0_16 = arith.constant 0 : index
    %c0_17 = arith.constant 0 : index
    %21 = vector.load %arg7[%c0_15, %c0_16, %c0_17] : memref<1x1x32xf32, #tpu.memory_space<vmem>>, vector<1x1x32xf32>
    tpu.vector_store %arg7[%c0_15, %c0_16, %c0_17], %20 {strides = array<i32>} : memref<1x1x32xf32, #tpu.memory_space<vmem>>, vector<1x1x32xf32>,
    return
  }
  func.func @transform_0(%arg0: i32) -> (i32, i32) {
    %c0_i32 = arith.constant 0 : i32
    %c0_i32_0 = arith.constant 0 : i32
    return %arg0, %c0_i32 : i32, i32
  }
  func.func @transform_1(%arg0: i32) -> (i32, i32) {
    %c0_i32 = arith.constant 0 : i32
    %c0_i32_0 = arith.constant 0 : i32
    %c0_i32_1 = arith.constant 0 : i32
    return %c0_i32, %c0_i32_0 : i32, i32
  }
  func.func @transform_2(%arg0: i32) -> (i32, i32) {
    %c0_i32 = arith.constant 0 : i32
    %c0_i32_0 = arith.constant 0 : i32
    %c0_i32_1 = arith.constant 0 : i32
    return %c0_i32, %c0_i32_0 : i32, i32
  }
  func.func @transform_3(%arg0: i32) -> (i32, i32) {
    %c0_i32 = arith.constant 0 : i32
    %c0_i32_0 = arith.constant 0 : i32
    %c0_i32_1 = arith.constant 0 : i32
    return %c0_i32, %c0_i32_0 : i32, i32
  }
  func.func @transform_4(%arg0: i32) -> (i32, i32) {
    %c0_i32 = arith.constant 0 : i32
    %c0_i32_0 = arith.constant 0 : i32
    return %arg0, %c0_i32 : i32, i32
  }
  func.func @transform_5(%arg0: i32) -> (i32, i32, i32) {
    %c0_i32 = arith.constant 0 : i32
    %c0_i32_0 = arith.constant 0 : i32
    %c0_i32_1 = arith.constant 0 : i32
    return %arg0, %c0_i32, %c0_i32_0 : i32, i32, i32
  }
  func.func @transform_6(%arg0: i32) -> (i32, i32, i32) {
    %c0_i32 = arith.constant 0 : i32
    %c0_i32_0 = arith.constant 0 : i32
    %c0_i32_1 = arith.constant 0 : i32
    return %arg0, %c0_i32, %c0_i32_0 : i32, i32, i32
  }
}

</mosaic_0001>

<bundles_post_ra>
// kernel: estimate_rho_bn.4
= control target key start
LH: loop header
LB: loop body
LE: loop exit
PB: predicated region body
PF: predicated region fallthrough
CT: control target
= control target key end

     0   :  { %v307_v1 = vmov 0   ;;  %vm65_vm0 = vcmask 261120   ;;  %v308_v11 = vmov 1966171168   ;;  %v188_v13 = vlaneseq  ;;  %s381_s1 = inlined_call_operand.vmem [shape: bf16[32,512], index: 1, kind: input, shape index: {}]   ;;  %s382_s0 = inlined_call_operand.vmem [shape: f32[8,32], index: 0, kind: input, shape index: {}]   ;;  %s383_s2 = inlined_call_operand.vmem [shape: f32[8,512], index: 2, kind: output, shape index: {0}]   ;;  %s384_s3 = inlined_call_operand.vmem [shape: f32[1,1,512], index: 3, kind: output, shape index: {1}]   ;;  %s385_s4 = inlined_call_operand.vmem [shape: f32[1,1,512], index: 4, kind: output, shape index: {2}]  }
   0x1   :  { %v295_v0 = vld [vmem:[%s381_s1 + $0x24] ss:$16 sps:$4 sm:$0xff]   ;;  %101 = vmatprep.mubr.bf16.mxu0 %v307_v1  ;;  %142 = vmatprep.mubr.bf16.mxu1 %v307_v1  ;;  %v297_v2 = vld [vmem:[%s381_s1 + $0x2c] ss:$16 sps:$4 sm:$0xff]   ;;  %v299_v3 = vld [vmem:[%s381_s1 + $0x20] ss:$16 sps:$4 sm:$0xff]   ;;  %v186_v12 = vunpack.c.l.s4 %v308_v11 }
   0x2   :  { %81 = vmatprep.subr.bf16.mxu0 %v295_v0  ;;  %v300_v4 = vld [vmem:[%s381_s1 + $0x28] ss:$16 sps:$4 sm:$0xff]   ;;  %122 = vmatprep.subr.bf16.mxu1 %v297_v2  ;;  %v301_v5 = vld [vmem:[%s381_s1 + $0x4] ss:$16 sps:$4 sm:$0xff]   ;;  %v303_v6 = vld [vmem:[%s381_s1 + $0xc] ss:$16 sps:$4 sm:$0xff]  }
   0x3   :  { %82 = vmatpush1.bf16.msra.mxu0 %v299_v3  ;;  %123 = vmatpush1.bf16.msra.mxu1 %v300_v4  ;;  %v305_v7 = vld [vmem:[%s381_s1] ss:$16 sps:$4 sm:$0xff]   ;;  %v306_v8 = vld [vmem:[%s381_s1 + $0x8] ss:$16 sps:$4 sm:$0xff]   ;;  %v187_v21 = vunpack.c.0.s8 %v186_v12  ;;  %v189_v22 = vshrl.u32 %v188_v13, 7  ;;  %vm210_vm1 = vcmp.lt.s32.totalorder %v188_v13, 512 }
   0x4   :  { %83 = vmatprep.subr.bf16.mxu0 %v301_v5  ;;  %v15_v9 = vld [vmem:[%s382_s0] sm:$0xff]  ;;  %124 = vmatprep.subr.bf16.mxu1 %v303_v6 }
   0x5   :  { %v16_v10 = vpack.c.bf16 %v15_v9, %v15_v9  ;;  %v190_v4 = vsub.s32 %v187_v21, %v189_v22 }
   0x7   :  { %84 = vmatpush1.bf16.msra.mxu0 %v305_v7  ;;  %125 = vmatpush1.bf16.msra.mxu1 %v306_v8 }
   0xa   :  { %291 = vmatmul.mubr.msk.bf16.vlgmr.msra.gmra.mxu0 %vm65_vm0, %v16_v10  ;;  %292 = vmatmul.mubr.msk.bf16.vlgmr.msra.gmra.mxu1 %vm65_vm0, %v16_v10 }
  0xca   :  { %v103_v14 = vpop.f32.mrf.mxu0  ;;  %v144_v15 = vpop.f32.mrf.mxu1 }
  0xcb   :  { %151 = vst [vmem:[%s383_s2] sm:$0xff] %v103_v14  ;;  %v155_v16 = vrot.slane %v103_v14, 4  ;;  %v213_v17 = vmul.f32 %v103_v14, %v103_v14  ;;  %153 = vst [vmem:[%s383_s2 + $0x10] sm:$0xff] %v144_v15  ;;  %v167_v18 = vrot.slane %v144_v15, 4  ;;  %v215_v19 = vmul.f32 %v144_v15, %v144_v15 }
  0xcc   :  { %v105_v20 = vpop.f32.mrf.mxu0  ;;  %v146_v23 = vpop.f32.mrf.mxu1 }
  0xcd   :  { %v156_v24 = vadd.f32 %v155_v16, %v103_v14  ;;  %v217_v25 = vrot.slane %v213_v17, 4  ;;  %v168_v26 = vadd.f32 %v167_v18, %v144_v15  ;;  %v229_v27 = vrot.slane %v215_v19, 4  ;;  %152 = vst [vmem:[%s383_s2 + $0x8] sm:$0xff] %v105_v20  ;;  %154 = vst [vmem:[%s383_s2 + $0x18] sm:$0xff] %v146_v23 }
  0xce   :  { %v161_v28 = vrot.slane %v105_v20, 4  ;;  %v214_v29 = vmul.f32 %v105_v20, %v105_v20  ;;  %v173_v30 = vrot.slane %v146_v23, 4  ;;  %v216_v31 = vmul.f32 %v146_v23, %v146_v23  ;;  %v107_v32 = vpop.f32.mrf.mxu0  ;;  %v148_v33 = vpop.f32.mrf.mxu1 }
  0xcf   :  { %v157_v34 = vrot.slane %v156_v24, 2  ;;  %v218_v35 = vadd.f32 %v217_v25, %v213_v17  ;;  %v169_v36 = vrot.slane %v168_v26, 2  ;;  %v230_v37 = vadd.f32 %v229_v27, %v215_v19 }
  0xd0   :  { %v162_v38 = vadd.f32 %v161_v28, %v105_v20  ;;  %v223_v39 = vrot.slane %v214_v29, 4  ;;  %v174_v40 = vadd.f32 %v173_v30, %v146_v23  ;;  %v235_v41 = vrot.slane %v216_v31, 4  ;;  %v108_v42 = vpop.f32.mrf.mxu0  ;;  %v149_v43 = vpop.f32.mrf.mxu1 }
  0xd1   :  { %v158_v44 = vadd.f32 %v157_v34, %v156_v24  ;;  %v219_v45 = vrot.slane %v218_v35, 2  ;;  %v170_v46 = vadd.f32 %v169_v36, %v168_v26  ;;  %v231_v47 = vrot.slane %v230_v37, 2 }
  0xd2   :  { %v163_v48 = vrot.slane %v162_v38, 2  ;;  %v224_v49 = vadd.f32 %v223_v39, %v214_v29  ;;  %v175_v50 = vrot.slane %v174_v40, 2  ;;  %v236_v51 = vadd.f32 %v235_v41, %v216_v31 }
  0xd3   :  { %v159_v52 = vrot.slane %v158_v44, 1  ;;  %v220_v53 = vadd.f32 %v219_v45, %v218_v35  ;;  %v171_v54 = vrot.slane %v170_v46, 1  ;;  %v232_v55 = vadd.f32 %v231_v47, %v230_v37 }
  0xd4   :  { %v164_v56 = vadd.f32 %v163_v48, %v162_v38  ;;  %v225_v57 = vrot.slane %v224_v49, 2  ;;  %v176_v58 = vadd.f32 %v175_v50, %v174_v40  ;;  %v237_v59 = vrot.slane %v236_v51, 2 }
  0xd5   :  { %v221_v60 = vrot.slane %v220_v53, 1  ;;  %v233_v61 = vrot.slane %v232_v55, 1  ;;  %v160_v2 = vadd.f32 %v159_v52, %v158_v44  ;;  %v172_v3 = vadd.f32 %v171_v54, %v170_v46 }
  0xd6   :  { %v165_v62 = vrot.slane %v164_v56, 1  ;;  %v226_v63 = vadd.f32 %v225_v57, %v224_v49  ;;  %v177_v0 = vrot.slane %v176_v58, 1  ;;  %v238_v1 = vadd.f32 %v237_v59, %v236_v51 }
  0xd7   :  { %v222_v9 = vadd.f32 %v221_v60, %v220_v53  ;;  %v234_v10 = vadd.f32 %v233_v61, %v232_v55 }
  0xd8   :  { %v166_v5 = vadd.f32 %v165_v62, %v164_v56  ;;  %v227_v6 = vrot.slane %v226_v63, 1  ;;  %v178_v7 = vadd.f32 %v177_v0, %v176_v58  ;;  %v239_v8 = vrot.slane %v238_v1, 1 }
  0xda   :  { %v183_v11 = vcombine.low %v160_v2, %v166_v5  ;;  %v228_v12 = vadd.f32 %v227_v6, %v226_v63  ;;  %v184_v14 = vcombine.low %v172_v3, %v178_v7  ;;  %v240_v15 = vadd.f32 %v239_v8, %v238_v1 }
  0xdc   :  { %v191_v16 = vrot.slane %v183_v11, %v190_v4  ;;  %v245_v17 = vcombine.low %v222_v9, %v228_v12  ;;  %v198_v18 = vrot.slane %v184_v14, %v190_v4  ;;  %v246_v19 = vcombine.low %v234_v10, %v240_v15 }
  0xde   :  { %v253_v20 = vrot.slane %v245_v17, %v190_v4  ;;  %v199_v23 = vcombine.low %v191_v16, %v198_v18  ;;  %v260_v24 = vrot.slane %v246_v19, %v190_v4 }
  0xe0   :  { %v206_v21 = vrot.slane %v199_v23, %v190_v4  ;;  %v261_v22 = vcombine.low %v253_v20, %v260_v24 }
  0xe2   :  { %212 = vst.msk [vmem:[%s384_s3] sm:$0xf] %vm210_vm1, %v206_v21  ;;  %v268_v25 = vrot.slane %v261_v22, %v190_v4 }
  0xe4   :  { %270 = vst.msk [vmem:[%s385_s4] sm:$0xf] %vm210_vm1, %v268_v25 }

// kernel: estimate_rho_bn.7
= control target key start
LH: loop header
LB: loop body
LE: loop exit
PB: predicated region body
PF: predicated region fallthrough
CT: control target
= control target key end

     0   :  { %v152_v0 = vmov 0.0   ;;  %vm153_vm0 = vmmov 0   ;;  %vm63_vm1 = vcmask 261120   ;;  %vm121_vm3 = vcmask 31744   ;;  %s205_s3 = inlined_call_operand.vmem [shape: bf16[32,4], index: 3, kind: input, shape index: {}]   ;;  %s206_s0 = inlined_call_operand.vmem [shape: f32[8,32], index: 0, kind: input, shape index: {}]   ;;  %s207_s1 = inlined_call_operand.vmem [shape: f32[1,32], index: 1, kind: input, shape index: {}]   ;;  %s208_s2 = inlined_call_operand.vmem [shape: f32[1,32], index: 2, kind: input, shape index: {}]   ;;  %s209_s4 = inlined_call_operand.vmem [shape: f32[1,4], index: 4, kind: input, shape index: {}]   ;;  %s210_s5 = inlined_call_operand.vmem [shape: f32[8,4], index: 5, kind: output, shape index: {}]  }
   0x1   :  { %136 = vmatprep.subr.bf16.mxu0 %v152_v0  ;;  %v146_v1 = vld [vmem:[%s205_s3 + $0x8] sm:$0xff]   ;;  %140 = vmatprep.mubr.msk.bf16.mxu0 %vm153_vm0, %v152_v0  ;;  %v147_v2 = vld [vmem:[%s205_s3] sm:$0xff]  }
   0x2   :  { %137 = vmatpush3.bf16.msra.mxu0 %v146_v1  ;;  %v21_v3 = vld [vmem:[%s206_s0] sm:$0xff] }
   0x3   :  { %v127_v4 = vld [vmem:[%s207_s1] ss:$0 sm:$0xff]  ;;  %138 = vmatprep.subr.bf16.mxu0 %v152_v0 }
   0x4   :  { %v128_v5 = vld [vmem:[%s208_s2] ss:$0 sm:$0xff]  ;;  %v29_v6 = vmul.f32 %v127_v4, %v21_v3 }
   0x5   :  { %v129_v10 = vld [vmem:[%s209_s4] ss:$0 sm:$0xff] }
   0x6   :  { %v37_v7 = vadd.f32 %v128_v5, %v29_v6  ;;  %139 = vmatpush3.bf16.msra.mxu0 %v147_v2 }
   0x8   :  { %v38_v8 = vmax.f32 %v37_v7, 0.0 }
   0xa   :  { %v39_v9 = vpack.c.bf16 %v38_v8, %v38_v8 }
   0xc   :  { %141 = vmatmul.mubr.msk.bf16.vlgmr.msra.gmra.mxu0 %vm63_vm1, %v39_v9 }
  0xcc   :  { %v101_v11 = vpop.f32.mrf.mxu0 }
  0xcd   :  { %v102_v12 = vadd.f32 %v129_v10, %v101_v11 }
  0xce   :  { %v142_v13 = vpop.f32.mrf.mxu0 }
  0xcf   :  { %v108_v14 = vmin.f32 %v102_v12, 20.0  ;;  %vm107_vm4 = vcmp.gt.f32.partialorder %v102_v12, 20.0 }
  0xd0   :  { %v104_v15 = vpop.f32.mrf.mxu0 }
  0xd1   :  { %v109_v16 = vmul.f32 1.442695, %v108_v14 }
  0xd2   :  { %v143_v17 = vpop.f32.mrf.mxu0 }
  0xd3   :  { %148 = vpow2.f32 %v109_v16 }
  0xe0   :  { %v149_v18 = vpop.eup %148 }
  0xe1   :  { %v111_v19 = vadd.f32 1.0, %v149_v18  ;;  %v114_v20 = vmul.f32 -0.5, %v149_v18  ;;  %v117_v22 = vand.u32 2147483647, %v149_v18 }
  0xe3   :  { %150 = vlog2.f32 %v111_v19  ;;  %v115_v21 = vadd.f32 1.0, %v114_v20  ;;  %vm118_vm2 = vcmp.lt.f32.partialorder %v117_v22, 0.0004427343 }
  0xe5   :  { %v116_v25 = vmul.f32 %v149_v18, %v115_v21 }
  0xf0   :  { %v151_v23 = vpop.eup %150 }
  0xf1   :  { %v113_v24 = vmul.f32 0.6931472, %v151_v23 }
  0xf3   :  { %v119_v26 = vsel %vm118_vm2, %v116_v25, %v113_v24 }
  0xf4   :  { %v120_v27 = vsel %vm107_vm4, %v102_v12, %v119_v26 }
  0xf5   :  { %122 = vst.msk [vmem:[%s210_s5] sm:$0xff] %vm121_vm3, %v120_v27 }

// kernel: estimate_rho_bn.6
= control target key start
LH: loop header
LB: loop body
LE: loop exit
PB: predicated region body
PF: predicated region fallthrough
CT: control target
= control target key end

     0   :  { %v225_v0 = vmov 0.0   ;;  %vm226_vm0 = vmmov 0   ;;  %vm144_vm1 = vcmask 261120   ;;  %vm153_vm2 = vcmask 253952   ;;  %s304_s3 = inlined_call_operand.vmem [shape: bf16[128,32], index: 3, kind: input, shape index: {}]   ;;  %s305_s0 = inlined_call_operand.vmem [shape: f32[8,128], index: 0, kind: input, shape index: {}]   ;;  %s306_s1 = inlined_call_operand.vmem [shape: f32[1,128], index: 1, kind: input, shape index: {}]   ;;  %s307_s2 = inlined_call_operand.vmem [shape: f32[1,128], index: 2, kind: input, shape index: {}]   ;;  %s308_s4 = inlined_call_operand.vmem [shape: f32[8,32], index: 4, kind: output, shape index: {0}]   ;;  %s309_s5 = inlined_call_operand.vmem [shape: f32[1,1,32], index: 5, kind: output, shape index: {1}]   ;;  %s310_s6 = inlined_call_operand.vmem [shape: f32[1,1,32], index: 6, kind: output, shape index: {2}]  }
   0x1   :  { %195 = vmatprep.subr.bf16.mxu0 %v225_v0  ;;  %v217_v1 = vld [vmem:[%s304_s3 + $0x38] sm:$0xff]   ;;  %211 = vmatprep.mubr.msk.bf16.mxu0 %vm226_vm0, %v225_v0  ;;  %v218_v2 = vld [vmem:[%s304_s3 + $0x30] sm:$0xff]   ;;  %v219_v3 = vld [vmem:[%s304_s3 + $0x28] sm:$0xff]  }
   0x2   :  { %196 = vmatpush3.bf16.msra.mxu0 %v217_v1  ;;  %v220_v4 = vld [vmem:[%s304_s3 + $0x20] sm:$0xff]   ;;  %v221_v5 = vld [vmem:[%s304_s3 + $0x18] sm:$0xff]   ;;  %v222_v9 = vld [vmem:[%s304_s3 + $0x10] sm:$0xff]  }
   0x3   :  { %197 = vmatprep.subr.bf16.mxu0 %v225_v0  ;;  %v21_v6 = vld [vmem:[%s305_s0] sm:$0xff]  ;;  %v223_v12 = vld [vmem:[%s304_s3 + $0x8] sm:$0xff]  }
   0x4   :  { %v176_v7 = vld [vmem:[%s306_s1] ss:$0 sm:$0xff] }
   0x5   :  { %v29_v8 = vmul.f32 %v176_v7, %v21_v6  ;;  %v177_v10 = vld [vmem:[%s307_s2] ss:$0 sm:$0xff] }
   0x6   :  { %198 = vmatpush3.bf16.msra.mxu0 %v218_v2  ;;  %v224_v14 = vld [vmem:[%s304_s3] sm:$0xff]  }
   0x7   :  { %199 = vmatprep.subr.bf16.mxu0 %v225_v0  ;;  %v37_v11 = vadd.f32 %v177_v10, %v29_v8 }
   0x9   :  { %v38_v13 = vmax.f32 %v37_v11, 0.0 }
   0xa   :  { %200 = vmatpush3.bf16.msra.mxu0 %v219_v3 }
   0xb   :  { %201 = vmatprep.subr.bf16.mxu0 %v225_v0  ;;  %v39_v15 = vpack.c.bf16 %v38_v13, %v38_v13 }
   0xe   :  { %202 = vmatpush3.bf16.msra.mxu0 %v220_v4 }
   0xf   :  { %203 = vmatprep.subr.bf16.mxu0 %v225_v0 }
  0x12   :  { %204 = vmatpush3.bf16.msra.mxu0 %v221_v5 }
  0x13   :  { %205 = vmatprep.subr.bf16.mxu0 %v225_v0 }
  0x16   :  { %206 = vmatpush3.bf16.msra.mxu0 %v222_v9 }
  0x17   :  { %207 = vmatprep.subr.bf16.mxu0 %v225_v0 }
  0x1a   :  { %208 = vmatpush3.bf16.msra.mxu0 %v223_v12 }
  0x1b   :  { %209 = vmatprep.subr.bf16.mxu0 %v225_v0 }
  0x1e   :  { %210 = vmatpush3.bf16.msra.mxu0 %v224_v14 }
  0x21   :  { %212 = vmatmul.mubr.bf16.vlgmr.msra.gmra.mxu0 %v39_v15 }
  0xe1   :  { %v138_v16 = vpop.f32.mrf.mxu0 }
  0xe2   :  { %145 = vst.msk [vmem:[%s308_s4] sm:$0xff] %vm144_vm1, %v138_v16  ;;  %v146_v17 = vsel %vm144_vm1, %v138_v16, 0.0  ;;  %v155_v18 = vmul.f32 %v138_v16, %v138_v16 }
  0xe3   :  { %v147_v19 = vrot.slane %v146_v17, 4  ;;  %v213_v20 = vpop.f32.mrf.mxu0 }
  0xe4   :  { %v156_v21 = vsel %vm144_vm1, %v155_v18, 0.0 }
  0xe5   :  { %v148_v22 = vadd.f32 %v147_v19, %v146_v17  ;;  %v157_v23 = vrot.slane %v156_v21, 4  ;;  %v141_v24 = vpop.f32.mrf.mxu0 }
  0xe7   :  { %v149_v25 = vrot.slane %v148_v22, 2  ;;  %v158_v26 = vadd.f32 %v157_v23, %v156_v21  ;;  %v214_v27 = vpop.f32.mrf.mxu0 }
  0xe9   :  { %v150_v28 = vadd.f32 %v149_v25, %v148_v22  ;;  %v159_v29 = vrot.slane %v158_v26, 2 }
  0xeb   :  { %v151_v30 = vrot.slane %v150_v28, 1  ;;  %v160_v31 = vadd.f32 %v159_v29, %v158_v26 }
  0xed   :  { %v152_v32 = vadd.f32 %v151_v30, %v150_v28  ;;  %v161_v33 = vrot.slane %v160_v31, 1 }
  0xef   :  { %154 = vst.msk [vmem:[%s309_s5] sm:$0x1] %vm153_vm2, %v152_v32  ;;  %v162_v34 = vadd.f32 %v161_v33, %v160_v31 }
  0xf1   :  { %163 = vst.msk [vmem:[%s310_s6] sm:$0x1] %vm153_vm2, %v162_v34 }

// kernel: estimate_rho_bn.5
= control target key start
LH: loop header
LB: loop body
LE: loop exit
PB: predicated region body
PF: predicated region fallthrough
CT: control target
= control target key end

     0   :  { %v27_v20 = vlaneseq  ;;  %s715_s3 = inlined_call_operand.vmem [shape: bf16[512,128], index: 3, kind: input, shape index: {}]   ;;  %s716_s0 = inlined_call_operand.vmem [shape: f32[8,512], index: 0, kind: input, shape index: {}]   ;;  %s717_s1 = inlined_call_operand.vmem [shape: f32[1,512], index: 1, kind: input, shape index: {}]   ;;  %s718_s2 = inlined_call_operand.vmem [shape: f32[1,512], index: 2, kind: input, shape index: {}]   ;;  %s719_s4 = inlined_call_operand.vmem [shape: f32[8,128], index: 4, kind: output, shape index: {0}]   ;;  %s720_s5 = inlined_call_operand.vmem [shape: f32[1,1,128], index: 5, kind: output, shape index: {1}]   ;;  %s721_s6 = inlined_call_operand.vmem [shape: f32[1,1,128], index: 6, kind: output, shape index: {2}]  }
   0x1   :  { %v525_v0 = vld [vmem:[%s715_s3 + $0x78] sm:$0xff]   ;;  %v529_v4 = vld [vmem:[%s715_s3 + $0x70] sm:$0xff]   ;;  %v533_v8 = vld [vmem:[%s715_s3 + $0x68] sm:$0xff]  }
   0x2   :  { %v526_v1 = vld [vmem:[%s715_s3 + $0xf8] sm:$0xff]   ;;  %481 = vmatprep.subr.bf16.mxu0 %v525_v0  ;;  %v530_v5 = vld [vmem:[%s715_s3 + $0xf0] sm:$0xff]   ;;  %v534_v9 = vld [vmem:[%s715_s3 + $0xe8] sm:$0xff]   ;;  %v28_v25 = vshrl.u32 %v27_v20, 7 }
   0x3   :  { %v527_v2 = vld [vmem:[%s715_s3 + $0x38] sm:$0xff]   ;;  %503 = vmatprep.subr.bf16.mxu1 %v526_v1  ;;  %v531_v6 = vld [vmem:[%s715_s3 + $0x30] sm:$0xff]   ;;  %v535_v10 = vld [vmem:[%s715_s3 + $0x28] sm:$0xff]  }
   0x4   :  { %v528_v3 = vld [vmem:[%s715_s3 + $0xb8] sm:$0xff]   ;;  %482 = vmatpush3.bf16.msra.mxu0 %v527_v2  ;;  %v532_v7 = vld [vmem:[%s715_s3 + $0xb0] sm:$0xff]   ;;  %v536_v11 = vld [vmem:[%s715_s3 + $0xa8] sm:$0xff]   ;;  %v33_v30 = vsub.s32 1, %v28_v25  ;;  %v41_v32 = vsub.s32 3, %v28_v25  ;;  %v29_v34 = vsub.s32 0, %v28_v25 }
   0x5   :  { %504 = vmatpush3.bf16.msra.mxu1 %v528_v3  ;;  %483 = vmatprep.subr.bf16.mxu0 %v529_v4  ;;  %v537_v12 = vld [vmem:[%s715_s3 + $0x60] sm:$0xff]   ;;  %v541_v16 = vld [vmem:[%s715_s3 + $0x58] sm:$0xff]   ;;  %v545_v21 = vld [vmem:[%s715_s3 + $0x50] sm:$0xff]   ;;  %v37_v36 = vsub.s32 2, %v28_v25 }
   0x6   :  { %505 = vmatprep.subr.bf16.mxu1 %v530_v5  ;;  %v538_v13 = vld [vmem:[%s715_s3 + $0xe0] sm:$0xff]   ;;  %v542_v17 = vld [vmem:[%s715_s3 + $0xd8] sm:$0xff]   ;;  %v546_v22 = vld [vmem:[%s715_s3 + $0xd0] sm:$0xff]  }
   0x7   :  { %v539_v14 = vld [vmem:[%s715_s3 + $0x20] sm:$0xff]   ;;  %v543_v18 = vld [vmem:[%s715_s3 + $0x18] sm:$0xff]   ;;  %v547_v23 = vld [vmem:[%s715_s3 + $0x10] sm:$0xff]  }
   0x8   :  { %484 = vmatpush3.bf16.msra.mxu0 %v531_v6  ;;  %v540_v15 = vld [vmem:[%s715_s3 + $0xa0] sm:$0xff]   ;;  %v544_v19 = vld [vmem:[%s715_s3 + $0x98] sm:$0xff]   ;;  %v548_v24 = vld [vmem:[%s715_s3 + $0x90] sm:$0xff]  }
   0x9   :  { %506 = vmatpush3.bf16.msra.mxu1 %v532_v7  ;;  %485 = vmatprep.subr.bf16.mxu0 %v533_v8  ;;  %v549_v26 = vld [vmem:[%s715_s3 + $0x48] sm:$0xff]   ;;  %v553_v31 = vld [vmem:[%s715_s3 + $0x40] sm:$0xff]   ;;  %v24_v43 = vld [vmem:[%s716_s0 + $0x18] sm:$0xff] }
   0xa   :  { %507 = vmatprep.subr.bf16.mxu1 %v534_v9  ;;  %v550_v27 = vld [vmem:[%s715_s3 + $0xc8] sm:$0xff]   ;;  %v554_v33 = vld [vmem:[%s715_s3 + $0xc0] sm:$0xff]   ;;  %v23_v47 = vld [vmem:[%s716_s0 + $0x10] sm:$0xff] }
   0xb   :  { %v551_v28 = vld [vmem:[%s715_s3 + $0x8] sm:$0xff]   ;;  %v555_v35 = vld [vmem:[%s715_s3] sm:$0xff]  }
   0xc   :  { %486 = vmatpush3.bf16.msra.mxu0 %v535_v10  ;;  %v552_v29 = vld [vmem:[%s715_s3 + $0x88] sm:$0xff]   ;;  %v556_v37 = vld [vmem:[%s715_s3 + $0x80] sm:$0xff]  }
   0xd   :  { %508 = vmatpush3.bf16.msra.mxu1 %v536_v11  ;;  %487 = vmatprep.subr.bf16.mxu0 %v537_v12  ;;  %v22_v38 = vld [vmem:[%s716_s0 + $0x8] sm:$0xff]  ;;  %v25_v39 = vld [vmem:[%s717_s1] sm:$0xf] }
   0xe   :  { %509 = vmatprep.subr.bf16.mxu1 %v538_v13  ;;  %v51_v40 = vld [vmem:[%s718_s2] sm:$0xf]  ;;  %v34_v41 = vrot.slane %v25_v39, %v33_v30  ;;  %v42_v44 = vrot.slane %v25_v39, %v41_v32  ;;  %v30_v48 = vrot.slane %v25_v39, %v29_v34  ;;  %v38_v50 = vrot.slane %v25_v39, %v37_v36 }
   0xf   :  { %v60_v42 = vrot.slane %v51_v40, %v33_v30  ;;  %v68_v45 = vrot.slane %v51_v40, %v41_v32  ;;  %v21_v46 = vld [vmem:[%s716_s0] sm:$0xff]  ;;  %v56_v49 = vrot.slane %v51_v40, %v29_v34  ;;  %v64_v51 = vrot.slane %v51_v40, %v37_v36 }
  0x10   :  { %488 = vmatpush3.bf16.msra.mxu0 %v539_v14  ;;  %v48_v52 = vmul.f32 %v34_v41, %v22_v38  ;;  %v50_v53 = vmul.f32 %v42_v44, %v24_v43  ;;  %v47_v54 = vmul.f32 %v30_v48, %v21_v46  ;;  %v49_v55 = vmul.f32 %v38_v50, %v23_v47 }
  0x11   :  { %510 = vmatpush3.bf16.msra.mxu1 %v540_v15  ;;  %489 = vmatprep.subr.bf16.mxu0 %v541_v16 }
  0x12   :  { %511 = vmatprep.subr.bf16.mxu1 %v542_v17  ;;  %v74_v56 = vadd.f32 %v60_v42, %v48_v52  ;;  %v76_v57 = vadd.f32 %v68_v45, %v50_v53  ;;  %v73_v58 = vadd.f32 %v56_v49, %v47_v54  ;;  %v75_v59 = vadd.f32 %v64_v51, %v49_v55 }
  0x14   :  { %490 = vmatpush3.bf16.msra.mxu0 %v543_v18  ;;  %v78_v60 = vmax.f32 %v74_v56, 0.0  ;;  %v80_v61 = vmax.f32 %v76_v57, 0.0  ;;  %v77_v62 = vmax.f32 %v73_v58, 0.0  ;;  %v79_v63 = vmax.f32 %v75_v59, 0.0 }
  0x15   :  { %512 = vmatpush3.bf16.msra.mxu1 %v544_v19  ;;  %491 = vmatprep.subr.bf16.mxu0 %v545_v21 }
  0x16   :  { %513 = vmatprep.subr.bf16.mxu1 %v546_v22  ;;  %v82_v0 = vpack.c.bf16 %v78_v60, %v78_v60  ;;  %v84_v1 = vpack.c.bf16 %v80_v61, %v80_v61  ;;  %v81_v2 = vpack.c.bf16 %v77_v62, %v77_v62  ;;  %v83_v3 = vpack.c.bf16 %v79_v63, %v79_v63 }
  0x18   :  { %492 = vmatpush3.bf16.msra.mxu0 %v547_v23  ;;  %373 = vmatprep.mubr.bf16.mxu0 %v82_v0 }
  0x19   :  { %514 = vmatpush3.bf16.msra.mxu1 %v548_v24  ;;  %493 = vmatprep.subr.bf16.mxu0 %v549_v26 }
  0x1a   :  { %515 = vmatprep.subr.bf16.mxu1 %v550_v27  ;;  %413 = vmatprep.mubr.bf16.mxu1 %v84_v1 }
  0x1c   :  { %494 = vmatpush3.bf16.msra.mxu0 %v551_v28 }
  0x1d   :  { %516 = vmatpush3.bf16.msra.mxu1 %v552_v29  ;;  %495 = vmatprep.subr.bf16.mxu0 %v553_v31 }
  0x1e   :  { %517 = vmatprep.subr.bf16.mxu1 %v554_v33 }
  0x20   :  { %496 = vmatpush3.bf16.msra.mxu0 %v555_v35 }
  0x21   :  { %518 = vmatpush3.bf16.msra.mxu1 %v556_v37 }
  0x23   :  { %374 = vmatmul.mubr.bf16.vlgmr.msra.gmra.mxu0 %v81_v2 }
  0x24   :  { %414 = vmatmul.mubr.bf16.vlgmr.msra.gmra.mxu1 %v83_v3 }
  0xe3   :  { %v497_v4 = vpop.f32.mrf.mxu0 }
  0xe4   :  { %v519_v5 = vpop.f32.mrf.mxu1 }
  0xe5   :  { %v498_v6 = vpop.f32.mrf.mxu0 }
  0xe6   :  { %v520_v7 = vpop.f32.mrf.mxu1  ;;  %v499_v8 = vadd.f32 %v498_v6, %v497_v4 }
  0xe7   :  { %v521_v9 = vadd.f32 %v520_v7, %v519_v5  ;;  %v500_v10 = vpop.f32.mrf.mxu0 }
  0xe8   :  { %v522_v11 = vpop.f32.mrf.mxu1 }
  0xe9   :  { %v416_v12 = vadd.f32 %v521_v9, %v499_v8  ;;  %v501_v13 = vpop.f32.mrf.mxu0 }
  0xea   :  { %v523_v14 = vpop.f32.mrf.mxu1 }
  0xeb   :  { %421 = vst [vmem:[%s719_s4] sm:$0xff] %v416_v12  ;;  %v422_v15 = vrot.slane %v416_v12, 4  ;;  %v429_v16 = vmul.f32 %v416_v12, %v416_v12 }
  0xed   :  { %v423_v17 = vadd.f32 %v422_v15, %v416_v12  ;;  %v430_v18 = vrot.slane %v429_v16, 4 }
  0xef   :  { %v424_v19 = vrot.slane %v423_v17, 2  ;;  %v431_v20 = vadd.f32 %v430_v18, %v429_v16 }
  0xf1   :  { %v425_v21 = vadd.f32 %v424_v19, %v423_v17  ;;  %v432_v22 = vrot.slane %v431_v20, 2 }
  0xf3   :  { %v426_v23 = vrot.slane %v425_v21, 1  ;;  %v433_v24 = vadd.f32 %v432_v22, %v431_v20 }
  0xf5   :  { %v427_v25 = vadd.f32 %v426_v23, %v425_v21  ;;  %v434_v26 = vrot.slane %v433_v24, 1 }
  0xf7   :  { %428 = vst [vmem:[%s720_s5] sm:$0x1] %v427_v25  ;;  %v435_v27 = vadd.f32 %v434_v26, %v433_v24 }
  0xf9   :  { %436 = vst [vmem:[%s721_s6] sm:$0x1] %v435_v27 }

</bundles_post_ra>
